<compile_context>
chip_gen: v7x
topology: tpu7x:2x2x1
jax: 0.10.0
libtpu: 0.0.40
codegen_flags: <defaults>
</compile_context>

<pallas_src>
import jax
import jax.numpy as jnp
from jax.experimental import pallas as pl
from jax.experimental.pallas import tpu as pltpu


def _scale_add_kernel(x0_ref, x1_ref, w_ref, o_ref):
    # x0/x1/o: (block_r, block_cols).
    # w: either (block_r, 1)   -> broadcasts over lanes   (H*W >= 128 path), or
    #           (1, block_cols) -> broadcasts over sublanes (H*W <  128 path).
    o_ref[...] = x0_ref[...] + x1_ref[...] * w_ref[...]


def _round_down(x, m):
    return max(m, (x // m) * m) if x >= m else x


def _vmem_budget_and_limit():
    """(double-buffered working-set budget, vmem_limit_bytes) per generation."""
    try:
        vmem = pltpu.get_tpu_info().vmem_capacity_bytes
    except Exception:
        # Unknown / query failed: assume the smallest VMEM (v7x, 64 MiB).
        vmem = 64 * 1024 * 1024
    if vmem >= 96 * 1024 * 1024:
        # v5e / v6e: 128 MiB physical VMEM -> ~6 MiB per stream tile.
        return 36 * 1024 * 1024, 64 * 1024 * 1024
    # v7x: 64 MiB physical, 32 MiB scoped default -> ~4-5 MiB per stream tile,
    # which keeps the fixed ~0.35 us/step pipeline overhead small at ~3.2 TB/s.
    return 28 * 1024 * 1024, 48 * 1024 * 1024


def scale_add(x0, x1, weight):
    """out = x0 + x1 * weight[None, :, None, None]  (NCHW inputs)."""
    assert x0.shape == x1.shape
    N, C, H, W = x0.shape
    assert weight.shape == (C,)

    itemsize = jnp.dtype(x0.dtype).itemsize
    row_align = 8 if itemsize >= 4 else (16 if itemsize == 2 else 32)
    budget, vmem_limit = _vmem_budget_and_limit()

    hw = H * W
    # Cast weight to the input dtype (matches the PyTorch forward when the
    # module dtype == input dtype; intentional deviation under mixed precision).
    w_cast = weight.astype(x0.dtype)

    if hw >= 128:
        # Path A: rows span batch *and* channel, weight is a per-row column.
        rows, cols = N * C, hw
        x0_2d = x0.reshape(rows, cols)
        x1_2d = x1.reshape(rows, cols)
        w_2d = jnp.tile(w_cast, N).reshape(rows, 1)  # w_2d[n*C + c] == weight[c]
        w_is_column = True
    else:
        # Path B: tiny spatial dims -> fold C*H*W into the lane axis and
        # pre-broadcast the weight into a single dense row.
        rows, cols = N, C * hw
        x0_2d = x0.reshape(rows, cols)
        x1_2d = x1.reshape(rows, cols)
        w_2d = jnp.broadcast_to(w_cast[:, None], (C, hw)).reshape(1, cols)
        w_is_column = False

    # Lane (last-dim) tile: multiple of 128 (unmasked vst); need not divide
    # `cols` -- edge blocks are padded.  Capped so that even at the minimum
    # row count the double-buffered footprint stays within budget.
    if cols >= 128:
        lane_cap = max(128, _round_down(budget // (2 * 3 * row_align * itemsize), 128))
        block_cols = min(_round_down(cols, 128), lane_cap)
    else:
        # Full (tiny) lane dim; masked stores, but total data is KiB-scale.
        block_cols = cols

    # Sublane (row) tile: fill the remaining footprint budget.  The weight
    # column pads to 128 lanes in VMEM, so account for it explicitly.
    w_pad_lanes = 128 if w_is_column else 0
    per_row_bytes = 2 * (3 * block_cols + w_pad_lanes) * itemsize  # x0+x1+out+w, double-buffered
    row_cap = max(row_align, budget // per_row_bytes)
    if rows >= row_align:
        block_r = min(_round_down(rows, row_align), _round_down(row_cap, row_align))
    else:
        block_r = rows  # full (tiny) sublane dim is always legal

    grid = (pl.cdiv(rows, block_r), pl.cdiv(cols, block_cols))

    x_spec = pl.BlockSpec((block_r, block_cols), lambda i, j: (i, j))
    o_spec = pl.BlockSpec((block_r, block_cols), lambda i, j: (i, j))
    if w_is_column:
        # Column index fixed at 0; the weight block only changes when the row
        # block changes (inner grid axis is columns), so it is not re-DMA'd
        # every step.
        w_spec = pl.BlockSpec((block_r, 1), lambda i, j: (i, 0))
    else:
        w_spec = pl.BlockSpec((1, block_cols), lambda i, j: (0, j))

    out_2d = pl.pallas_call(
        _scale_add_kernel,
        out_shape=jax.ShapeDtypeStruct((rows, cols), x0.dtype),
        grid_spec=pltpu.PrefetchScalarGridSpec(
            num_scalar_prefetch=0,
            grid=grid,
            in_specs=[x_spec, x_spec, w_spec],
            out_specs=o_spec,
        ),
        compiler_params=pltpu.CompilerParams(
            # Independent output blocks -> both axes parallel (v7x megacore).
            # TODO(synk): if an xprof trace on v7x shows single-TC execution,
            # switch the leading axis to pltpu.CORE_PARALLEL.
            dimension_semantics=("parallel", "parallel"),
            vmem_limit_bytes=vmem_limit,
        ),
    )(x0_2d, x1_2d, w_2d)

    return out_2d.reshape(N, C, H, W)


if __name__ == "__main__":
    # Small deterministic example: N=2, C=4, H=W=16 (NCHW, matching PyTorch).
    key = jax.random.PRNGKey(0)
    k0, k1, kw = jax.random.split(key, 3)
    N, C, H, W = 2, 4, 16, 16

    x0 = jax.random.normal(k0, (N, C, H, W), dtype=jnp.float32)
    x1 = jax.random.normal(k1, (N, C, H, W), dtype=jnp.float32)
    # The module initializes weight to zeros; use a deterministic non-trivial
    # value here so the multiply path is actually exercised.
    weight = jax.random.normal(kw, (C,), dtype=jnp.float32)

    out = jax.block_until_ready(scale_add(x0, x1, weight))

    # Reference (plain JAX, mirrors the PyTorch forward exactly).
    ref = x0 + x1 * weight.reshape(1, C, 1, 1)
    assert out.shape == (N, C, H, W)
    assert jnp.allclose(out, ref, atol=1e-6, rtol=1e-6), "mismatch vs reference"

    print("KERNEL_OK")
</pallas_src>

<mosaic_0001>
module attributes {stable_mosaic.version = 11 : i64} {
  func.func @_scale_add_kernel(%arg0: i32, %arg1: i32, %arg2: memref<8x256xf32, #tpu.memory_space<vmem>>, %arg3: memref<8x256xf32, #tpu.memory_space<vmem>>, %arg4: memref<8x1xf32, #tpu.memory_space<vmem>>, %arg5: memref<8x256xf32, #tpu.memory_space<vmem>>) attributes {dimension_semantics = [#tpu.dimension_semantics<parallel>, #tpu.dimension_semantics<parallel>], iteration_bounds = array<i64: 1, 1>, scalar_prefetch = 0 : i64, scratch_operands = 0 : i64, tpu.core_type = #tpu.core_type<tc>, window_params = [{transform_indices = @transform_0, window_bounds = array<i64: 8, 256>}, {transform_indices = @transform_1, window_bounds = array<i64: 8, 256>}, {transform_indices = @transform_2, window_bounds = array<i64: 8, 1>}, {transform_indices = @transform_3, window_bounds = array<i64: 8, 256>}]} {
    %c0 = arith.constant 0 : index
    %c0_0 = arith.constant 0 : index
    %0 = vector.load %arg2[%c0, %c0_0] : memref<8x256xf32, #tpu.memory_space<vmem>>, vector<8x256xf32>
    %c0_1 = arith.constant 0 : index
    %c0_2 = arith.constant 0 : index
    %1 = vector.load %arg3[%c0_1, %c0_2] : memref<8x256xf32, #tpu.memory_space<vmem>>, vector<8x256xf32>
    %c0_3 = arith.constant 0 : index
    %c0_4 = arith.constant 0 : index
    %2 = vector.load %arg4[%c0_3, %c0_4] : memref<8x1xf32, #tpu.memory_space<vmem>>, vector<8x1xf32>
    %3 = vector.broadcast %2 : vector<8x1xf32> to vector<8x256xf32>
    %4 = arith.mulf %1, %3 : vector<8x256xf32>
    %5 = arith.addf %0, %4 : vector<8x256xf32>
    %c0_5 = arith.constant 0 : index
    %c0_6 = arith.constant 0 : index
    %6 = vector.load %arg5[%c0_5, %c0_6] : memref<8x256xf32, #tpu.memory_space<vmem>>, vector<8x256xf32>
    tpu.vector_store %arg5[%c0_5, %c0_6], %5 {strides = array<i32>} : memref<8x256xf32, #tpu.memory_space<vmem>>, vector<8x256xf32>,
    return
  }
  func.func @transform_0(%arg0: i32, %arg1: i32) -> (i32, i32) {
    %c0_i32 = arith.constant 0 : i32
    return %arg0, %arg1 : i32, i32
  }
  func.func @transform_1(%arg0: i32, %arg1: i32) -> (i32, i32) {
    %c0_i32 = arith.constant 0 : i32
    return %arg0, %arg1 : i32, i32
  }
  func.func @transform_2(%arg0: i32, %arg1: i32) -> (i32, i32) {
    %c0_i32 = arith.constant 0 : i32
    %c0_i32_0 = arith.constant 0 : i32
    return %arg0, %c0_i32 : i32, i32
  }
  func.func @transform_3(%arg0: i32, %arg1: i32) -> (i32, i32) {
    %c0_i32 = arith.constant 0 : i32
    return %arg0, %arg1 : i32, i32
  }
}

</mosaic_0001>

<bundles_post_ra>
// kernel: tpu_custom_call.1
= control target key start
LH: loop header
LB: loop body
LE: loop exit
PB: predicated region body
PF: predicated region fallthrough
CT: control target
= control target key end

     0   :  { %8 = vsyncpa [#allocation3], 0  ;;  %s211_s0 = inlined_call_operand.hbm [shape: f32[8,256], index: 0, kind: input, shape index: {}]   ;;  %s212_s1 = inlined_call_operand.hbm [shape: f32[8,256], index: 1, kind: input, shape index: {}]   ;;  %s213_s2 = inlined_call_operand.vmem [shape: f32[8,1], index: 2, kind: input, shape index: {}]   ;;  %s214_s3 = inlined_call_operand.hbm [shape: f32[8,256], index: 3, kind: output, shape index: {}]  }
   0x1   :  { %9 = vsyncpa [#allocation6], 0 }
   0x2   :  { %10 = vsyncpa [#allocation4], 0  ;;  %s148_s12 = smov [#allocation2]   ;;  %s149_s14 = smov [#allocation5]  }
   0x3   :  { %s17_s13 = sshll.u32 %s148_s12, 4  ;;  %s27_s15 = sshll.u32 %s149_s14, 4  ;;  %s18_s13 = int_to_ptr.vmem [resolvable:$true] %s17_s13  ;;  %s28_s15 = int_to_ptr.vmem [resolvable:$true] %s27_s15 }
   0x4   :  { %s76_s18 = scalar_lea.hbm %s211_s0, 256 }
   0x5   :  { %p77_p0 = scmp.ne.s32.totalorder %s211_s0, %s76_s18  ;;  %p80_p1 = scmp.lt.u32.totalorder %s76_s18, %s211_s0 }
   0x7   :  { %p82_p2 = pnand %p80_p1, %p77_p0 }
   0x9   :  { %85 = shalt.err (!%p82_p2)
}
   0xa   :  { %s86_s23 = scalar_lea.vmem %s18_s13, 256  ;;  %p91_p4 = scmp.lt.s32.totalorder %s18_s13, %s18_s13 }
   0xb   :  { %p87_p3 = scmp.ne.s32.totalorder %s18_s13, %s86_s23  ;;  %p92_p5 = scmp.lt.s32.totalorder %s86_s23, %s86_s23 }
   0xd   :  { %p93_p6 = por %p92_p5, %p91_p4 }
   0xf   :  { %p94_p7 = pnand %p93_p6, %p87_p3 }
  0x11   :  { %97 = shalt.err (!%p94_p7)
}
  0x12   :  { %20 = dma.hbm_to_vmem [thread:$0]  %s211_s0, 256, %s18_s13, [#allocation3]  }
  0x13   :  { %s98_s28 = scalar_lea.hbm %s212_s1, 256 }
  0x14   :  { %p99_p8 = scmp.ne.s32.totalorder %s212_s1, %s98_s28  ;;  %p102_p9 = scmp.lt.u32.totalorder %s98_s28, %s212_s1 }
  0x16   :  { %p104_p10 = pnand %p102_p9, %p99_p8 }
  0x18   :  { %107 = shalt.err (!%p104_p10)
}
  0x19   :  { %s108_s6 = scalar_lea.vmem %s28_s15, 256  ;;  %p113_p12 = scmp.lt.s32.totalorder %s28_s15, %s28_s15 }
  0x1a   :  { %p109_p11 = scmp.ne.s32.totalorder %s28_s15, %s108_s6  ;;  %p114_p13 = scmp.lt.s32.totalorder %s108_s6, %s108_s6 }
  0x1c   :  { %p115_p0 = por %p114_p13, %p113_p12 }
  0x1e   :  { %p116_p1 = pnand %p115_p0, %p109_p11 }
  0x20   :  { %119 = shalt.err (!%p116_p1)
}
  0x21   :  { %30 = dma.hbm_to_vmem [thread:$0]  %s212_s1, 256, %s28_s15, [#allocation6]  }
  0x22   :  { %142 = dma.done.wait [#allocation3], 256  }
  0x23   :  { %143 = vsyncadd [#allocation3], 4294967040 }
  0x24   :  { %144 = dma.done.wait [#allocation6], 256  }
  0x25   :  { %145 = vsyncadd [#allocation6], 4294967040  ;;  %v150_v0 = vmov 0   ;;  %v43_v1 = vld [vmem:[%s213_s2] sm:$0xff]  ;;  %v41_v2 = vld [vmem:[#allocation5] sm:$0xff]  ;;  %s151_s10 = smov [#allocation7]  }
  0x26   :  { %75 = vset.pattern.permute.xlu0 %v150_v0  ;;  %v42_v3 = vld [vmem:[#allocation5 + $0x8] sm:$0xff]  ;;  %v39_v5 = vld [vmem:[#allocation2] sm:$0xff]  ;;  %v40_v6 = vld [vmem:[#allocation2 + $0x8] sm:$0xff]  ;;  %s61_s11 = sshll.u32 %s151_s10, 4  ;;  %s62_s11 = int_to_ptr.vmem [resolvable:$true] %s61_s11 }
  0x27   :  { %46 = vperm.xlu0 %75, %v43_v1   ;;  %s120_s1 = scalar_lea.vmem %s62_s11, 256  ;;  %p125_p3 = scmp.lt.s32.totalorder %s62_s11, %s62_s11 }
  0x28   :  { %p121_p2 = scmp.ne.s32.totalorder %s62_s11, %s120_s1  ;;  %p126_p4 = scmp.lt.s32.totalorder %s120_s1, %s120_s1 }
  0x2a   :  { %p127_p5 = por %p126_p4, %p125_p3 }
  0x2c   :  { %p128_p6 = pnand %p127_p5, %p121_p2 }
  0xa6   :  { %v47_v4 = vpop.permute.xlu0 %46 }
  0xa7   :  { %v49_v7 = vmul.f32 %v47_v4, %v41_v2  ;;  %v50_v8 = vmul.f32 %v47_v4, %v42_v3 }
  0xa9   :  { %v51_v9 = vadd.f32 %v49_v7, %v39_v5  ;;  %v52_v10 = vadd.f32 %v50_v8, %v40_v6 }
  0xab   :  { %53 = vst [vmem:[#allocation7] sm:$0xff] %v51_v9  ;;  %54 = vst [vmem:[#allocation7 + $0x8] sm:$0xff] %v52_v10 }
  0xac   :  { %131 = shalt.err (!%p128_p6)
}
  0xad   :  { %s132_s13 = scalar_lea.hbm %s214_s3, 256 }
  0xae   :  { %p133_p7 = scmp.ne.s32.totalorder %s214_s3, %s132_s13  ;;  %p136_p8 = scmp.lt.u32.totalorder %s132_s13, %s214_s3 }
  0xb0   :  { %p138_p9 = pnand %p136_p8, %p133_p7 }
  0xb2   :  { %141 = shalt.err (!%p138_p9)
}
  0xb3   :  { %64 = dma.vmem_to_hbm [thread:$0]  %s62_s11, 256, %s214_s3, [#allocation4]  }
  0xb4   :  { %146 = dma.done.wait [#allocation4], 256  }
  0xb5   :  { %147 = vsyncadd [#allocation4], 4294967040 }
  0xb6   :  { %68 = vsyncpa [#allocation3], 1 }
  0xb7   :  { %69 = vsyncpa [#allocation6], 1 }
  0xb8   :  { %70 = vsyncpa [#allocation4], 1 }

</bundles_post_ra>
